<compile_context>
chip_gen: v6e
topology: v6e:2x2x1
jax: 0.10.0
libtpu: 0.0.40
codegen_flags: <defaults>
</compile_context>

<pallas_src>
import functools

import jax
import jax.numpy as jnp
from jax.experimental import pallas as pl
from jax.experimental.pallas import tpu as pltpu


# ----------------------------------------------------------------------------- kernel
def _dwt_conv_kernel(x_ref, wl_ref, wh_ref, bl_ref, bh_ref, low_ref, high_ref):
    # x_ref:   (1, 4C, TL)  activations, pixel dim TL on lanes
    # wl/wh:   (Cout, 4C)   VMEM-resident folded weights
    # bl/bh:   (Cout, 1)    biases (broadcast along lanes)
    # low/high:(1, Cout, TL)
    x = x_ref[0]                                                      # (4C, TL)
    low = jnp.dot(wl_ref[...], x, preferred_element_type=jnp.float32) + bl_ref[...]
    high = jnp.dot(wh_ref[...], x, preferred_element_type=jnp.float32) + bh_ref[...]
    low_ref[0] = low.astype(low_ref.dtype)
    high_ref[0] = high.astype(high_ref.dtype)


# ----------------------------------------------------------------------------- tiling helpers
def _cdiv(a, b):
    return -(-a // b)


def _rnd_up(a, b):
    return _cdiv(a, b) * b


def _vmem_budget_bytes():
    """Budget for the double-buffered pipeline blocks (input + 2 outputs)."""
    try:  # v5e / v6e have 128 MiB physical VMEM; v7x only 64 MiB.
        cap = getattr(pltpu.get_tpu_info(), "vmem_capacity_bytes", None)
        if cap is not None and cap >= 128 * 1024 * 1024:
            return 24 * 1024 * 1024
    except Exception:
        pass
    return 12 * 1024 * 1024


def _choose_col_tile(n_cols, k4, cout, itemsize, budget_bytes):
    """Balanced, 128-aligned lane tile, accounting for sublane padding."""
    # bytes per lane-column of the double-buffered pipeline blocks
    bpc = itemsize * 2 * (_rnd_up(k4, 8) + 2 * _rnd_up(cout, 8))
    cap = max(128, (budget_bytes // bpc) // 128 * 128)
    if n_cols <= cap:
        return n_cols                       # single (possibly <128-wide) block == full dim
    n_blocks = _cdiv(n_cols, cap)
    return _rnd_up(_cdiv(n_cols, n_blocks), 128)


# ----------------------------------------------------------------------------- wrapper
@functools.partial(jax.jit, static_argnames=("compute_dtype", "max_block_bytes"))
def dwt_transform(x, w_low, b_low, w_high, b_high,
                  compute_dtype=jnp.float32, max_block_bytes=None):
    """x: (B, C, H, W).  w_low: (Cout, C, 1, 1), w_high: (Cout, 3C, 1, 1).
    Returns (low, high), each (B, Cout, H/2, W/2) float32."""
    f32 = jnp.float32
    B, C, H, W = x.shape
    Cout = w_low.shape[0]
    H2, W2 = H // 2, W // 2
    L = H2 * W2
    K4 = 4 * C

    # ---- fold the Haar +/-1 signs and the 1/2 scale into the conv weights -----
    # Phase order along the 4C axis: p1=(row even, col even), p2=(row odd, col even),
    # p3=(row even, col odd), p4=(row odd, col odd); the module's x_i = p_i / 2.
    Wl = w_low.reshape(Cout, C).astype(f32)
    Wh = w_high.reshape(Cout, 3 * C).astype(f32)
    Wh1, Wh2, Wh3 = Wh[:, :C], Wh[:, C:2 * C], Wh[:, 2 * C:]
    w_low_t = 0.5 * jnp.concatenate([Wl, Wl, Wl, Wl], axis=1)              # (Cout, 4C)
    w_high_t = 0.5 * jnp.concatenate([-Wh1 - Wh2 + Wh3,
                                      -Wh1 + Wh2 - Wh3,
                                      Wh1 - Wh2 - Wh3,
                                      Wh1 + Wh2 + Wh3], axis=1)            # (Cout, 4C)
    b_low_t = b_low.reshape(Cout, 1).astype(f32)
    b_high_t = b_high.reshape(Cout, 1).astype(f32)

    # ---- single fused XLA pass: (B,C,H,W) -> (B, 4C, H2*W2), phases on 4C -----
    xr = x.reshape(B, C, H2, 2, W2, 2)                     # free split of H and W
    xt = jnp.transpose(xr, (0, 5, 3, 1, 2, 4)).reshape(B, K4, L)
    xt = xt.astype(compute_dtype)
    w_low_t = w_low_t.astype(compute_dtype)
    w_high_t = w_high_t.astype(compute_dtype)

    # ---- lane tiling (balanced, 128-aligned) + explicit VMEM budgeting --------
    itemsize = jnp.dtype(compute_dtype).itemsize
    budget = max_block_bytes if max_block_bytes is not None else _vmem_budget_bytes()
    TL = _choose_col_tile(L, K4, Cout, itemsize, budget)
    n_tiles = _cdiv(L, TL)

    blocks_b = itemsize * 2 * (_rnd_up(K4, 8) + 2 * _rnd_up(Cout, 8)) * TL   # dbl-buffered blocks
    interm_b = 4 * 2 * _rnd_up(Cout, 8) * TL                                  # f32 dot results
    params_b = itemsize * 2 * 2 * Cout * K4 + 4 * 2 * 2 * Cout                # resident weights/biases
    vmem_limit = int(min(100 * 2**20,
                         max(16 * 2**20, blocks_b + interm_b + params_b + 2 * 2**20)))

    cost = pl.CostEstimate(
        flops=2 * B * L * K4 * 2 * Cout,
        transcendentals=0,
        bytes_accessed=itemsize * (B * K4 * L + 2 * Cout * K4)
                       + 4 * (2 * B * Cout * L + 2 * Cout),
    )

    low2, high2 = pl.pallas_call(
        _dwt_conv_kernel,
        out_shape=(jax.ShapeDtypeStruct((B, Cout, L), f32),
                   jax.ShapeDtypeStruct((B, Cout, L), f32)),
        grid=(B, n_tiles),
        in_specs=[pl.BlockSpec((1, K4, TL), lambda b, t: (b, 0, t)),    # activations (tiled)
                  pl.BlockSpec((Cout, K4), lambda b, t: (0, 0)),        # low weight (resident)
                  pl.BlockSpec((Cout, K4), lambda b, t: (0, 0)),        # high weight (resident)
                  pl.BlockSpec((Cout, 1), lambda b, t: (0, 0)),         # low bias
                  pl.BlockSpec((Cout, 1), lambda b, t: (0, 0))],        # high bias
        out_specs=(pl.BlockSpec((1, Cout, TL), lambda b, t: (b, 0, t)),
                   pl.BlockSpec((1, Cout, TL), lambda b, t: (b, 0, t))),
        compiler_params=pltpu.CompilerParams(
            # Both grid axes are independent -> eligible for megacore sharding.
            dimension_semantics=("parallel", "parallel"),
            vmem_limit_bytes=vmem_limit),
        cost_estimate=cost,
    )(xt, w_low_t, w_high_t, b_low_t, b_high_t)

    # Already channel-major with pixels contiguous: reshape to NCHW is free.
    low = low2.reshape(B, Cout, H2, W2)
    high = high2.reshape(B, Cout, H2, W2)
    return low, high


# ----------------------------------------------------------------------------- reference + tests
def _reference(x, w_low, b_low, w_high, b_high):
    """Pure-JAX reference mirroring the PyTorch module."""
    x01 = x[:, :, 0::2, :] / 2
    x02 = x[:, :, 1::2, :] / 2
    x1 = x01[:, :, :, 0::2]
    x2 = x02[:, :, :, 0::2]
    x3 = x01[:, :, :, 1::2]
    x4 = x02[:, :, :, 1::2]
    x_LL = x1 + x2 + x3 + x4
    x_HL = -x1 - x2 + x3 + x4
    x_LH = -x1 + x2 - x3 + x4
    x_HH = x1 - x2 - x3 + x4
    high = jnp.concatenate((x_HL, x_LH, x_HH), axis=1)

    def conv1x1(t, w, b):
        Cout = w.shape[0]
        return (jnp.einsum('bchw,oc->bohw', t, w.reshape(Cout, -1))
                + b[None, :, None, None])

    return conv1x1(x_LL, w_low, b_low), conv1x1(high, w_high, b_high)


if __name__ == "__main__":
    def run_case(B, Cin, H, W, Cout, seed, **kw):
        key = jax.random.PRNGKey(seed)
        kx, kwl, kbl, kwh, kbh = jax.random.split(key, 5)
        x = jax.random.normal(kx, (B, Cin, H, W), dtype=jnp.float32)
        w_low = 0.1 * jax.random.normal(kwl, (Cout, Cin, 1, 1), dtype=jnp.float32)
        b_low = 0.1 * jax.random.normal(kbl, (Cout,), dtype=jnp.float32)
        w_high = 0.1 * jax.random.normal(kwh, (Cout, 3 * Cin, 1, 1), dtype=jnp.float32)
        b_high = 0.1 * jax.random.normal(kbh, (Cout,), dtype=jnp.float32)

        low, high = dwt_transform(x, w_low, b_low, w_high, b_high, **kw)
        jax.block_until_ready((low, high))

        ref_low, ref_high = _reference(x, w_low, b_low, w_high, b_high)
        assert low.shape == (B, Cout, H // 2, W // 2)
        assert high.shape == (B, Cout, H // 2, W // 2)
        assert jnp.allclose(low, ref_low, atol=1e-4, rtol=1e-4), \
            float(jnp.max(jnp.abs(low - ref_low)))
        assert jnp.allclose(high, ref_high, atol=1e-4, rtol=1e-4), \
            float(jnp.max(jnp.abs(high - ref_high)))

    # Small shape from the spec (single block per batch element).
    run_case(B=2, Cin=4, H=16, W=16, Cout=8, seed=0)
    # Larger spatial shape with a deliberately tiny block budget:
    # exercises the multi-tile grid (L divides evenly into 128-aligned tiles).
    run_case(B=2, Cin=4, H=96, W=96, Cout=8, seed=1, max_block_bytes=64 * 1024)
    # Non-square / different channel count with a ragged trailing lane block
    # (relies on Pallas masking, no padding pass).
    run_case(B=1, Cin=6, H=72, W=60, Cout=8, seed=2, max_block_bytes=64 * 1024)

    print("KERNEL_OK")
</pallas_src>

<mosaic_0001>
module attributes {stable_mosaic.version = 11 : i64} {
  func.func @_dwt_conv_kernel(%arg0: i32, %arg1: i32, %arg2: memref<1x16x64xf32, #tpu.memory_space<vmem>>, %arg3: memref<8x16xf32, #tpu.memory_space<vmem>>, %arg4: memref<8x16xf32, #tpu.memory_space<vmem>>, %arg5: memref<8x1xf32, #tpu.memory_space<vmem>>, %arg6: memref<8x1xf32, #tpu.memory_space<vmem>>, %arg7: memref<1x8x64xf32, #tpu.memory_space<vmem>>, %arg8: memref<1x8x64xf32, #tpu.memory_space<vmem>>) attributes {dimension_semantics = [#tpu.dimension_semantics<parallel>, #tpu.dimension_semantics<parallel>], iteration_bounds = array<i64: 2, 1>, scalar_prefetch = 0 : i64, scratch_operands = 0 : i64, tpu.core_type = #tpu.core_type<tc>, window_params = [{transform_indices = @transform_0, window_bounds = array<i64: 1, 16, 64>}, {pipeline_mode = #tpu.pipeline_mode<synchronous>, transform_indices = @transform_1, window_bounds = array<i64: 8, 16>}, {pipeline_mode = #tpu.pipeline_mode<synchronous>, transform_indices = @transform_2, window_bounds = array<i64: 8, 16>}, {pipeline_mode = #tpu.pipeline_mode<synchronous>, transform_indices = @transform_3, window_bounds = array<i64: 8, 1>}, {pipeline_mode = #tpu.pipeline_mode<synchronous>, transform_indices = @transform_4, window_bounds = array<i64: 8, 1>}, {transform_indices = @transform_5, window_bounds = array<i64: 1, 8, 64>}, {transform_indices = @transform_6, window_bounds = array<i64: 1, 8, 64>}]} {
    %c0 = arith.constant 0 : index
    %c0_0 = arith.constant 0 : index
    %c0_1 = arith.constant 0 : index
    %0 = vector.load %arg2[%c0, %c0_0, %c0_1] : memref<1x16x64xf32, #tpu.memory_space<vmem>>, vector<1x16x64xf32>
    %1 = vector.shape_cast %0 : vector<1x16x64xf32> to vector<16x64xf32>
    %c0_2 = arith.constant 0 : index
    %c0_3 = arith.constant 0 : index
    %2 = vector.load %arg3[%c0_2, %c0_3] : memref<8x16xf32, #tpu.memory_space<vmem>>, vector<8x16xf32>
    %cst = arith.constant dense<0.000000e+00> : vector<8x64xf32>
    %3 = tpu.matmul %2, %1, %cst {dimension_numbers = #tpu.dot_dimension_numbers<[1], [0], [0], [1], [0, 0, 1, 1], [], []>} : vector<8x16xf32>, vector<16x64xf32>, vector<8x64xf32> -> vector<8x64xf32>
    %c0_4 = arith.constant 0 : index
    %c0_5 = arith.constant 0 : index
    %4 = vector.load %arg5[%c0_4, %c0_5] : memref<8x1xf32, #tpu.memory_space<vmem>>, vector<8x1xf32>
    %5 = vector.broadcast %4 : vector<8x1xf32> to vector<8x64xf32>
    %6 = arith.addf %3, %5 : vector<8x64xf32>
    %c0_6 = arith.constant 0 : index
    %c0_7 = arith.constant 0 : index
    %7 = vector.load %arg4[%c0_6, %c0_7] : memref<8x16xf32, #tpu.memory_space<vmem>>, vector<8x16xf32>
    %cst_8 = arith.constant dense<0.000000e+00> : vector<8x64xf32>
    %8 = tpu.matmul %7, %1, %cst_8 {dimension_numbers = #tpu.dot_dimension_numbers<[1], [0], [0], [1], [0, 0, 1, 1], [], []>} : vector<8x16xf32>, vector<16x64xf32>, vector<8x64xf32> -> vector<8x64xf32>
    %c0_9 = arith.constant 0 : index
    %c0_10 = arith.constant 0 : index
    %9 = vector.load %arg6[%c0_9, %c0_10] : memref<8x1xf32, #tpu.memory_space<vmem>>, vector<8x1xf32>
    %10 = vector.broadcast %9 : vector<8x1xf32> to vector<8x64xf32>
    %11 = arith.addf %8, %10 : vector<8x64xf32>
    %c0_11 = arith.constant 0 : index
    %c0_12 = arith.constant 0 : index
    %c0_13 = arith.constant 0 : index
    %12 = vector.load %arg7[%c0_11, %c0_12, %c0_13] : memref<1x8x64xf32, #tpu.memory_space<vmem>>, vector<1x8x64xf32>
    %13 = vector.shape_cast %12 : vector<1x8x64xf32> to vector<8x64xf32>
    %14 = vector.shape_cast %6 : vector<8x64xf32> to vector<1x8x64xf32>
    tpu.vector_store %arg7[%c0_11, %c0_12, %c0_13], %14 {strides = array<i32>} : memref<1x8x64xf32, #tpu.memory_space<vmem>>, vector<1x8x64xf32>,
    %c0_14 = arith.constant 0 : index
    %c0_15 = arith.constant 0 : index
    %c0_16 = arith.constant 0 : index
    %15 = vector.load %arg8[%c0_14, %c0_15, %c0_16] : memref<1x8x64xf32, #tpu.memory_space<vmem>>, vector<1x8x64xf32>
    %16 = vector.shape_cast %15 : vector<1x8x64xf32> to vector<8x64xf32>
    %17 = vector.shape_cast %11 : vector<8x64xf32> to vector<1x8x64xf32>
    tpu.vector_store %arg8[%c0_14, %c0_15, %c0_16], %17 {strides = array<i32>} : memref<1x8x64xf32, #tpu.memory_space<vmem>>, vector<1x8x64xf32>,
    return
  }
  func.func @transform_0(%arg0: i32, %arg1: i32) -> (i32, i32, i32) {
    %c0_i32 = arith.constant 0 : i32
    %c0_i32_0 = arith.constant 0 : i32
    return %arg0, %c0_i32, %arg1 : i32, i32, i32
  }
  func.func @transform_1(%arg0: i32, %arg1: i32) -> (i32, i32) {
    %c0_i32 = arith.constant 0 : i32
    %c0_i32_0 = arith.constant 0 : i32
    %c0_i32_1 = arith.constant 0 : i32
    return %c0_i32, %c0_i32_0 : i32, i32
  }
  func.func @transform_2(%arg0: i32, %arg1: i32) -> (i32, i32) {
    %c0_i32 = arith.constant 0 : i32
    %c0_i32_0 = arith.constant 0 : i32
    %c0_i32_1 = arith.constant 0 : i32
    return %c0_i32, %c0_i32_0 : i32, i32
  }
  func.func @transform_3(%arg0: i32, %arg1: i32) -> (i32, i32) {
    %c0_i32 = arith.constant 0 : i32
    %c0_i32_0 = arith.constant 0 : i32
    %c0_i32_1 = arith.constant 0 : i32
    return %c0_i32, %c0_i32_0 : i32, i32
  }
  func.func @transform_4(%arg0: i32, %arg1: i32) -> (i32, i32) {
    %c0_i32 = arith.constant 0 : i32
    %c0_i32_0 = arith.constant 0 : i32
    %c0_i32_1 = arith.constant 0 : i32
    return %c0_i32, %c0_i32_0 : i32, i32
  }
  func.func @transform_5(%arg0: i32, %arg1: i32) -> (i32, i32, i32) {
    %c0_i32 = arith.constant 0 : i32
    %c0_i32_0 = arith.constant 0 : i32
    return %arg0, %c0_i32, %arg1 : i32, i32, i32
  }
  func.func @transform_6(%arg0: i32, %arg1: i32) -> (i32, i32, i32) {
    %c0_i32 = arith.constant 0 : i32
    %c0_i32_0 = arith.constant 0 : i32
    return %arg0, %c0_i32, %arg1 : i32, i32, i32
  }
}

</mosaic_0001>

<bundles_post_ra>
// kernel: dwt_transform.1
= control target key start
LH: loop header
LB: loop body
LE: loop exit
PB: predicated region body
PF: predicated region fallthrough
CT: control target
= control target key end

     0   :  { %s708_s21 = smov 0   ;;  %s710_s22 = smov 0   ;;  %s760_s0 = inlined_call_operand.vmem [shape: f32[2,16,64], index: 0, kind: input, shape index: {}]   ;;  %s761_s1 = inlined_call_operand.vmem [shape: f32[8,16], index: 1, kind: input, shape index: {}]   ;;  %s762_s2 = inlined_call_operand.vmem [shape: f32[8,16], index: 2, kind: input, shape index: {}]   ;;  %s763_s3 = inlined_call_operand.vmem [shape: f32[8,1], index: 3, kind: input, shape index: {}]   ;;  %s764_s4 = inlined_call_operand.vmem [shape: f32[8,1], index: 4, kind: input, shape index: {}]   ;;  %s765_s5 = inlined_call_operand.vmem [shape: f32[2,8,64], index: 5, kind: output, shape index: {0}]   ;;  %s766_s6 = inlined_call_operand.vmem [shape: f32[2,8,64], index: 6, kind: output, shape index: {1}]  }
   0x1   :  { %s712_s23 = smov 0  }
   0x2 LB: > { %s29_s24 = sadd.s32 1, %s664_s22  ;;  %p588_p0 = scmp.ge.s32.totalorder %s668_s23, 1  ;;  %s668_s23 = sphi %s712_s23, %s17_s23   ;;  %s664_s22 = sphi %s710_s22, %s768_s22   ;;  %s660_s21 = sphi %s708_s21, %s767_s21  }
   0x3   : > { %p31_p1 = scmp.ge.s32.totalorder %s29_s24, 2  ;;  %p236_p2 = scmp.lt.s32.totalorder %s668_s23, 3 }
   0x5   : > { %s770_s24 = smov (%p31_p1, %s29_s24), 0  ;;  %p237_p3 = pnand %p588_p0, %p236_p2 }
   0x6   : > { %p278_p4 = scmp.lt.s32.totalorder (!%p237_p3), %s660_s21, 1 }
   0x7   : > { %240 = sbr.rel (%p237_p3) target bundleno = 216 (0xd8), region = 40 }
   0xc   : > { %v670_v0 = vmov 0.0   ;;  %v303_v1 = vld [vmem:[%s763_s3] sm:$0xff]  ;;  %s772_s21 = smov (!%p278_p4, %s660_s21), 1  ;;  %vm671_vm0 = vmmov 0   ;;  %v672_v2 = vmov 0   ;;  %vm309_vm1 = vcmask 130048  }
   0xd   : > { %604 = vmatprep.subr.mxu0 %v670_v0  ;;  %611 = vmatprep.subr.mxu1 %v670_v0  ;;  %s597_s27 = sshll.u32 %s772_s21, 4  ;;  %v302_v5 = vld [vmem:[%s761_s1] sm:$0xff]  ;;  %s591_s13 = sshll.u32 %s772_s21, 3  ;;  %vm463_vm2 = vcmask 523264  }
   0xe   : > { %608 = vmatprep.mubr.msk.f32.mxu0 %vm671_vm0, %v670_v0  ;;  %615 = vmatprep.mubr.msk.f32.mxu1 %vm671_vm0, %v670_v0  ;;  %s285_s30 = scalar_lea.vmem %s760_s0, %s597_s27  ;;  %v383_v6 = vld [vmem:[%s762_s2] sm:$0xff]  ;;  %s292_s16 = scalar_lea.vmem %s765_s5, %s591_s13 }
   0xf   : > { %645 = vset.pattern.permute.xlu0 %v672_v2  ;;  %v301_v3 = vld [vmem:[%s285_s30 + $0x8] sm:$0xff]  ;;  %v300_v4 = vld [vmem:[%s285_s30] sm:$0xff]  ;;  %s299_s19 = scalar_lea.vmem %s766_s6, %s591_s13 }
  0x10   : > { %306 = vperm.xlu0 %645, %v303_v1   ;;  %605 = vmatpush3.msra.mxu0 %v301_v3  ;;  %v384_v7 = vld [vmem:[%s764_s4] sm:$0xff] }
  0x11   : > { %612 = vmatpush3.msra.mxu1 %v301_v3  ;;  %606 = vmatprep.subr.mxu0 %v670_v0 }
  0x12   : > { %613 = vmatprep.subr.mxu1 %v670_v0  ;;  %607 = vmatpush3.msra.mxu0 %v300_v4 }
  0x13   : > { %614 = vmatpush3.msra.mxu1 %v300_v4  ;;  %609 = vmatmul.mubr.msk.f32.vlgmr.msra.gmra.mxu0 %vm309_vm1, %v302_v5 }
  0x14   : > { %616 = vmatmul.mubr.msk.f32.vlgmr.msra.gmra.mxu1 %vm309_vm1, %v383_v6  ;;  %387 = vperm.xlu0 %645, %v384_v7  }
  0x8b   : > { %v307_v8 = vpop.permute.xlu0 %306 }
  0x8f   : > { %v388_v9 = vpop.permute.xlu0 %387 }
  0xd3   : > { %v379_v10 = vpop.f32.mrf.mxu0 }
  0xd4   : > { %v459_v11 = vpop.f32.mrf.mxu1  ;;  %v380_v12 = vadd.f32 %v379_v10, %v307_v8 }
  0xd5   : > { %v460_v13 = vadd.f32 %v459_v11, %v388_v9  ;;  %v610_v14 = vpop.f32.mrf.mxu0 }
  0xd6   : > { %v617_v15 = vpop.f32.mrf.mxu1  ;;  %464 = vst.msk [vmem:[%s292_s16] sm:$0xff] %vm463_vm2, %v380_v12 }
  0xd7   : > { %465 = vst.msk [vmem:[%s299_s19] sm:$0xff] %vm463_vm2, %v460_v13 }
  0xd8 PF: > { %s17_s23 = sadd.s32 1, %s668_s23   ;;  %s767_s21 = smov %s664_s22 }
  0xd9   : > { %p14_p5 = scmp.ge.s32.totalorder %s17_s23, 4   ;;  %s768_s22 = smov %s770_s24 }
  0xdb   :  { %16 = sbr.rel (!%p14_p5) target bundleno = 2 (0x2), region = 82 }

</bundles_post_ra>
